<compile_context>
chip_gen: v7x
topology: tpu7x:2x2x1
jax: 0.10.0
libtpu: 0.0.40
codegen_flags: <defaults>
</compile_context>

<pallas_src>
import functools
import math

import jax
import jax.numpy as jnp
from jax.experimental import pallas as pl
from jax.experimental.pallas import tpu as pltpu


# ----------------------------------------------------------------------------
# Kernel body (shared by both layouts; class_axis selects the reduce axis)
# ----------------------------------------------------------------------------

def _int_pow(base, e):
    """Exponentiation by squaring for small integer e >= 1 (VPU multiplies only)."""
    result = None
    acc = base
    while True:
        if e & 1:
            result = acc if result is None else result * acc
        e >>= 1
        if not e:
            break
        acc = acc * acc
    return result


def _focal_kernel(x_ref, t_ref, o_ref, *, class_axis, gamma, alpha_vec):
    # x_ref: logits block, classes along `class_axis` (native dtype, f32 or bf16)
    # t_ref: int32 targets, size 1 along `class_axis`
    # o_ref: per-element loss, same shape as t_ref
    x = x_ref[...]                                   # native dtype — no block upcast
    t = t_ref[...]                                   # int32

    # Numerically stable log-softmax along class_axis; max + gather stay in the
    # native dtype, only the exp-sum chain is widened to f32.
    m = jnp.max(x, axis=class_axis, keepdims=True)                     # native
    cls = jax.lax.broadcasted_iota(jnp.int32, x.shape, class_axis)
    sel = cls == t                                                      # one-hot mask
    xt = jnp.sum(jnp.where(sel, x, jnp.zeros([], x.dtype)),
                 axis=class_axis, keepdims=True)                        # gathered logit

    ez = jnp.exp((x - m).astype(jnp.float32))                           # f32 exp chain
    se = jnp.sum(ez, axis=class_axis, keepdims=True)                    # sum exp
    logpt = (xt.astype(jnp.float32) - m.astype(jnp.float32)) - jnp.log(se)

    g = float(gamma)
    if g != 0.0:
        # pt from the exponentials already computed for the lse -> no extra exp.
        et = jnp.sum(jnp.where(sel, ez, 0.0), axis=class_axis, keepdims=True)
        pt = et / se
        omp = 1.0 - pt
        if g == int(g) and 1 <= int(g) <= 8:
            mod = _int_pow(omp, int(g))                                 # e.g. gamma=2: 1 mul
        else:
            # non-integer gamma: guard pt == 1 so pow doesn't hit log(0)
            mod = jnp.where(
                omp > 0.0,
                jnp.power(jnp.maximum(omp, jnp.float32(1e-38)), jnp.float32(g)),
                0.0,
            )
    else:
        mod = None                                                      # gamma == 0: factor 1

    if alpha_vec is not None:
        a0, a1 = alpha_vec
        # PyTorch: at = alpha.gather(0, (target != 0).long()); logpt *= at
        logpt = logpt * jnp.where(t == 0, jnp.float32(a0), jnp.float32(a1))

    loss = -logpt if mod is None else -(mod * logpt)
    o_ref[...] = loss.astype(o_ref.dtype)


# ----------------------------------------------------------------------------
# Block / grid selection
# ----------------------------------------------------------------------------

def _round_down(x, m):
    return (x // m) * m


def _choose_blocks_sublane(n, c, hw, itemsize, budget_bytes,
                           min_steps=8, min_block_bytes=64 << 10):
    """Pick (Bn, T) for (Bn, C, T) logits blocks (classes on sublanes)."""
    # Lane tile T: multiple of 128 (full extent if hw < 128), capped by budget.
    if hw <= 128:
        t = hw
    else:
        t_cap = max(128, _round_down(budget_bytes // max(1, c * itemsize), 128))
        t = max(128, min(t_cap, _round_down(hw, 128)))
    # Images per grid step (amortize ~0.35 us/step overhead for small HW).
    bn = max(1, min(n, budget_bytes // max(1, c * t * itemsize)))

    # v7x megacore: prefer >= min_steps parallel steps, but never shrink blocks
    # below min_block_bytes (per-step overhead would dominate on tiny inputs).
    def steps(bn_, t_):
        return pl.cdiv(n, bn_) * pl.cdiv(hw, t_)

    while steps(bn, t) < min_steps and bn * c * t * itemsize > min_block_bytes:
        if bn > 1:
            bn = (bn + 1) // 2
        elif t > 128 and hw > 128:
            t = max(128, _round_down(t // 2, 128))
        else:
            break
    return bn, t


def _choose_rows(m, c, itemsize, budget_bytes, min_steps=8, min_block_bytes=64 << 10):
    """Pick TM for (TM, C) row blocks (classes on lanes, C >= 128)."""
    if m <= 8:
        return m
    tm_cap = max(8, _round_down(budget_bytes // max(1, c * itemsize), 8))
    tm = max(8, min(tm_cap, _round_down(m, 8)))
    while (pl.cdiv(m, tm) < min_steps and tm * c * itemsize > min_block_bytes
           and tm > 8):
        tm = max(8, _round_down(tm // 2, 8))
    return tm


# ----------------------------------------------------------------------------
# Wrappers
# ----------------------------------------------------------------------------

_VMEM_LIMIT = 32 * 1024 * 1024  # explicit: v5e scoped default (16 MiB) is too small;
                                # well under v7x's 64 MiB physical VMEM.


def _focal_classes_on_sublanes(x3, t3, gamma, alpha_vec, tile_budget_bytes, out_dtype):
    """x3: (N, C, HW) logits; t3: (N, 1, HW) int32. Classes on sublanes, HW on lanes."""
    N, C, hw = x3.shape
    itemsize = jnp.dtype(x3.dtype).itemsize
    bn, T = _choose_blocks_sublane(N, C, hw, itemsize, tile_budget_bytes)
    grid = (pl.cdiv(N, bn), pl.cdiv(hw, T))

    kernel = functools.partial(_focal_kernel, class_axis=1,
                               gamma=float(gamma), alpha_vec=alpha_vec)
    out = pl.pallas_call(
        kernel,
        out_shape=jax.ShapeDtypeStruct((N, 1, hw), out_dtype),
        grid=grid,
        in_specs=[
            pl.BlockSpec((bn, C, T), lambda n, j: (n, 0, j)),   # logits, no pre-transpose
            pl.BlockSpec((bn, 1, T), lambda n, j: (n, 0, j)),   # targets, lane-dense
        ],
        out_specs=pl.BlockSpec((bn, 1, T), lambda n, j: (n, 0, j)),  # loss, lane-dense
        compiler_params=pltpu.CompilerParams(
            dimension_semantics=("parallel", "parallel"),
            vmem_limit_bytes=_VMEM_LIMIT,
        ),
    )(x3, t3)
    return out.reshape(-1)


def _focal_classes_on_lanes(x2, t1, gamma, alpha_vec, tile_budget_bytes, out_dtype):
    """x2: (M, C) logits with C >= 128; t1: (M,) int32. Row-tiled, no transpose."""
    M, C = x2.shape
    itemsize = jnp.dtype(x2.dtype).itemsize
    tm = _choose_rows(M, C, itemsize, tile_budget_bytes)
    grid = (pl.cdiv(M, tm),)

    x3 = x2.reshape(1, M, C)           # metadata-only reshape
    t3 = t1.reshape(1, M, 1)

    kernel = functools.partial(_focal_kernel, class_axis=2,
                               gamma=float(gamma), alpha_vec=alpha_vec)
    out = pl.pallas_call(
        kernel,
        out_shape=jax.ShapeDtypeStruct((1, M, 1), out_dtype),
        grid=grid,
        in_specs=[
            pl.BlockSpec((1, tm, C), lambda i: (0, i, 0)),
            pl.BlockSpec((1, tm, 1), lambda i: (0, i, 0)),
        ],
        out_specs=pl.BlockSpec((1, tm, 1), lambda i: (0, i, 0)),
        compiler_params=pltpu.CompilerParams(
            dimension_semantics=("parallel",),
            vmem_limit_bytes=_VMEM_LIMIT,
        ),
    )(x3, t3)
    return out.reshape(-1)


def focal_loss(x, target, gamma=0.0, alpha=None, *,
               tile_budget_bytes=2 << 20, out_dtype=jnp.float32):
    """Forward pass of FocalLoss. Returns per-element loss of shape (M,).

    out_dtype can be set to jnp.bfloat16 to cut output HBM traffic for small-C
    workloads if downstream tolerates it.
    """
    # Normalize alpha exactly like the PyTorch module: only alpha[0]/alpha[1]
    # are ever gathered (keyed on target != 0), even for list alpha.
    if isinstance(alpha, (float, int)) and not isinstance(alpha, bool):
        alpha_vec = (float(alpha), 1.0 - float(alpha))
    elif isinstance(alpha, (list, tuple)):
        alpha_vec = (float(alpha[0]), float(alpha[1]))
    else:
        alpha_vec = None

    if x.ndim > 2:
        # NCHW (or NC...) -> view as (N, C, HW); NO transpose in HBM.
        N, C = x.shape[0], x.shape[1]
        hw = int(math.prod(x.shape[2:]))
        x3 = x.reshape(N, C, hw)
        t3 = target.reshape(N, 1, hw).astype(jnp.int32)
        return _focal_classes_on_sublanes(x3, t3, gamma, alpha_vec,
                                          tile_budget_bytes, out_dtype)

    # 2-D (M, C) path.
    M, C = x.shape
    t1 = target.reshape(M).astype(jnp.int32)
    if C >= 128:
        # Large C: tile rows directly, softmax along lanes — no HBM transpose.
        return _focal_classes_on_lanes(x, t1, gamma, alpha_vec,
                                       tile_budget_bytes, out_dtype)
    # Small C: one transpose so classes land on sublanes and the output stays
    # lane-dense (transpose cost is small relative to the lane-dense win here).
    x3 = jnp.transpose(x, (1, 0)).reshape(1, C, M)
    t3 = t1.reshape(1, 1, M)
    return _focal_classes_on_sublanes(x3, t3, gamma, alpha_vec,
                                      tile_budget_bytes, out_dtype)


# ----------------------------------------------------------------------------
# Pure-JAX reference (correctness check)
# ----------------------------------------------------------------------------

def _focal_loss_ref(x, target, gamma=0.0, alpha=None):
    if x.ndim > 2:
        N, C = x.shape[0], x.shape[1]
        x2 = jnp.transpose(x.reshape(N, C, -1), (0, 2, 1)).reshape(-1, C)
    else:
        x2 = x
    t = target.reshape(-1)
    logp = jax.nn.log_softmax(x2, axis=1)
    logpt = jnp.take_along_axis(logp, t[:, None], axis=1)[:, 0]
    pt = jnp.exp(logpt)
    if alpha is not None:
        a = (jnp.array([alpha, 1.0 - alpha], jnp.float32)
             if isinstance(alpha, (float, int)) else jnp.asarray(alpha, jnp.float32))
        at = a[(t != 0).astype(jnp.int32)]
        logpt = logpt * at
    return -1.0 * (1.0 - pt) ** gamma * logpt


if __name__ == "__main__":
    key = jax.random.PRNGKey(0)
    kx, kt, kx2, kt2, kx3, kt3 = jax.random.split(key, 6)

    # 4-D segmentation-style input (primary path: classes on sublanes).
    N, C, H, W = 2, 4, 16, 16
    x = jax.random.normal(kx, (N, C, H, W), dtype=jnp.float32)
    target = jax.random.randint(kt, (N, H, W), 0, C, dtype=jnp.int32)

    loss = focal_loss(x, target, gamma=2.0, alpha=0.25)
    jax.block_until_ready(loss)
    ref = _focal_loss_ref(x, target, gamma=2.0, alpha=0.25)
    assert loss.shape == (N * H * W,)
    assert jnp.allclose(loss, ref, atol=1e-5, rtol=1e-5), "mismatch (4D, gamma=2, alpha)"

    # gamma=0, no alpha — exercises the no-pt fast path.
    loss0 = focal_loss(x, target, gamma=0.0, alpha=None)
    jax.block_until_ready(loss0)
    ref0 = _focal_loss_ref(x, target, gamma=0.0, alpha=None)
    assert jnp.allclose(loss0, ref0, atol=1e-5, rtol=1e-5), "mismatch (4D, gamma=0)"

    # 2-D small-C path (single transpose, lane-dense kernel), list alpha.
    M2, C2 = 96, 4
    x2d = jax.random.normal(kx2, (M2, C2), dtype=jnp.float32)
    t2d = jax.random.randint(kt2, (M2,), 0, C2, dtype=jnp.int32)
    l2 = focal_loss(x2d, t2d, gamma=2.0, alpha=[0.3, 0.7])
    jax.block_until_ready(l2)
    r2 = _focal_loss_ref(x2d, t2d, gamma=2.0, alpha=[0.3, 0.7])
    assert jnp.allclose(l2, r2, atol=1e-5, rtol=1e-5), "mismatch (2D small-C)"

    # 2-D large-C path (no transpose; softmax along lanes).
    M3, C3 = 256, 128
    x2l = jax.random.normal(kx3, (M3, C3), dtype=jnp.float32)
    t2l = jax.random.randint(kt3, (M3,), 0, C3, dtype=jnp.int32)
    l3 = focal_loss(x2l, t2l, gamma=2.0, alpha=0.25)
    jax.block_until_ready(l3)
    r3 = _focal_loss_ref(x2l, t2l, gamma=2.0, alpha=0.25)
    assert jnp.allclose(l3, r3, atol=1e-5, rtol=1e-5), "mismatch (2D large-C)"

    print("KERNEL_OK")
</pallas_src>

<mosaic_0001>
module attributes {stable_mosaic.version = 11 : i64} {
  func.func @_focal_kernel(%arg0: i32, %arg1: i32, %arg2: memref<2x4x256xf32, #tpu.memory_space<vmem>>, %arg3: memref<2x1x256xi32, #tpu.memory_space<vmem>>, %arg4: memref<2x1x256xf32, #tpu.memory_space<vmem>>) attributes {dimension_semantics = [#tpu.dimension_semantics<parallel>, #tpu.dimension_semantics<parallel>], iteration_bounds = array<i64: 1, 1>, scalar_prefetch = 0 : i64, scratch_operands = 0 : i64, tpu.core_type = #tpu.core_type<tc>, window_params = [{transform_indices = @transform_0, window_bounds = array<i64: 2, 4, 256>}, {transform_indices = @transform_1, window_bounds = array<i64: 2, 1, 256>}, {transform_indices = @transform_2, window_bounds = array<i64: 2, 1, 256>}]} {
    %c0 = arith.constant 0 : index
    %c0_0 = arith.constant 0 : index
    %c0_1 = arith.constant 0 : index
    %0 = vector.load %arg2[%c0, %c0_0, %c0_1] : memref<2x4x256xf32, #tpu.memory_space<vmem>>, vector<2x4x256xf32>
    %c0_2 = arith.constant 0 : index
    %c0_3 = arith.constant 0 : index
    %c0_4 = arith.constant 0 : index
    %1 = vector.load %arg3[%c0_2, %c0_3, %c0_4] : memref<2x1x256xi32, #tpu.memory_space<vmem>>, vector<2x1x256xi32>
    %cst = arith.constant dense<0xFF800000> : vector<2x256xf32>
    %2 = vector.multi_reduction <maximumf>, %0, %cst [1] : vector<2x4x256xf32> to vector<2x256xf32>
    %3 = vector.shape_cast %2 : vector<2x256xf32> to vector<2x1x256xf32>
    %4 = tpu.iota {dimensions = array<i32: 1>} : vector<2x4x256xi32>
    %5 = vector.broadcast %1 : vector<2x1x256xi32> to vector<2x4x256xi32>
    %6 = arith.cmpi eq, %4, %5 : vector<2x4x256xi32>
    %cst_5 = arith.constant 0.000000e+00 : f32
    %7 = vector.broadcast %cst_5 : f32 to vector<2x4x256xf32>
    %8 = arith.select %6, %0, %7 : vector<2x4x256xi1>, vector<2x4x256xf32>
    %cst_6 = arith.constant dense<0.000000e+00> : vector<2x256xf32>
    %9 = vector.multi_reduction <add>, %8, %cst_6 [1] : vector<2x4x256xf32> to vector<2x256xf32>
    %10 = vector.shape_cast %9 : vector<2x256xf32> to vector<2x1x256xf32>
    %11 = vector.broadcast %3 : vector<2x1x256xf32> to vector<2x4x256xf32>
    %12 = arith.subf %0, %11 : vector<2x4x256xf32>
    %13 = math.exp %12 : vector<2x4x256xf32>
    %cst_7 = arith.constant dense<0.000000e+00> : vector<2x256xf32>
    %14 = vector.multi_reduction <add>, %13, %cst_7 [1] : vector<2x4x256xf32> to vector<2x256xf32>
    %15 = vector.shape_cast %14 : vector<2x256xf32> to vector<2x1x256xf32>
    %16 = arith.subf %10, %3 : vector<2x1x256xf32>
    %17 = math.log %15 : vector<2x1x256xf32>
    %18 = arith.subf %16, %17 : vector<2x1x256xf32>
    %cst_8 = arith.constant 0.000000e+00 : f32
    %19 = vector.broadcast %cst_8 : f32 to vector<2x4x256xf32>
    %20 = arith.select %6, %13, %19 : vector<2x4x256xi1>, vector<2x4x256xf32>
    %cst_9 = arith.constant dense<0.000000e+00> : vector<2x256xf32>
    %21 = vector.multi_reduction <add>, %20, %cst_9 [1] : vector<2x4x256xf32> to vector<2x256xf32>
    %22 = vector.shape_cast %21 : vector<2x256xf32> to vector<2x1x256xf32>
    %23 = arith.divf %22, %15 : vector<2x1x256xf32>
    %cst_10 = arith.constant 1.000000e+00 : f32
    %24 = vector.broadcast %cst_10 : f32 to vector<2x1x256xf32>
    %25 = arith.subf %24, %23 : vector<2x1x256xf32>
    %26 = arith.mulf %25, %25 : vector<2x1x256xf32>
    %c0_i32 = arith.constant 0 : i32
    %27 = vector.broadcast %c0_i32 : i32 to vector<2x1x256xi32>
    %28 = arith.cmpi eq, %1, %27 : vector<2x1x256xi32>
    %cst_11 = arith.constant 2.500000e-01 : f32
    %cst_12 = arith.constant 7.500000e-01 : f32
    %29 = vector.broadcast %cst_11 : f32 to vector<2x1x256xf32>
    %30 = vector.broadcast %cst_12 : f32 to vector<2x1x256xf32>
    %31 = arith.select %28, %29, %30 : vector<2x1x256xi1>, vector<2x1x256xf32>
    %32 = arith.mulf %18, %31 : vector<2x1x256xf32>
    %33 = arith.mulf %26, %32 : vector<2x1x256xf32>
    %cst_13 = arith.constant 0.000000e+00 : f32
    %34 = vector.broadcast %cst_13 : f32 to vector<2x1x256xf32>
    %35 = arith.subf %34, %33 : vector<2x1x256xf32>
    %c0_14 = arith.constant 0 : index
    %c0_15 = arith.constant 0 : index
    %c0_16 = arith.constant 0 : index
    %36 = vector.load %arg4[%c0_14, %c0_15, %c0_16] : memref<2x1x256xf32, #tpu.memory_space<vmem>>, vector<2x1x256xf32>
    tpu.vector_store %arg4[%c0_14, %c0_15, %c0_16], %35 {strides = array<i32>} : memref<2x1x256xf32, #tpu.memory_space<vmem>>, vector<2x1x256xf32>,
    return
  }
  func.func @transform_0(%arg0: i32, %arg1: i32) -> (i32, i32, i32) {
    %c0_i32 = arith.constant 0 : i32
    %c0_i32_0 = arith.constant 0 : i32
    return %arg0, %c0_i32, %arg1 : i32, i32, i32
  }
  func.func @transform_1(%arg0: i32, %arg1: i32) -> (i32, i32, i32) {
    %c0_i32 = arith.constant 0 : i32
    %c0_i32_0 = arith.constant 0 : i32
    return %arg0, %c0_i32, %arg1 : i32, i32, i32
  }
  func.func @transform_2(%arg0: i32, %arg1: i32) -> (i32, i32, i32) {
    %c0_i32 = arith.constant 0 : i32
    %c0_i32_0 = arith.constant 0 : i32
    return %arg0, %c0_i32, %arg1 : i32, i32, i32
  }
}

</mosaic_0001>

<bundles_post_ra>
// kernel: tpu_custom_call.1
= control target key start
LH: loop header
LB: loop body
LE: loop exit
PB: predicated region body
PF: predicated region fallthrough
CT: control target
= control target key end

     0   :  { %7 = vsyncpa [#allocation3], 0  ;;  %s628_s0 = inlined_call_operand.hbm [shape: f32[2,4,256], index: 0, kind: input, shape index: {}]   ;;  %s629_s1 = inlined_call_operand.hbm [shape: s32[2,1,256], index: 1, kind: input, shape index: {}]   ;;  %s630_s2 = inlined_call_operand.hbm [shape: f32[2,1,256], index: 2, kind: output, shape index: {}]  }
   0x1   :  { %8 = vsyncpa [#allocation6], 0 }
   0x2   :  { %9 = vsyncpa [#allocation4], 0  ;;  %s446_s9 = smov [#allocation2]   ;;  %s374_s13 = scalar_lea.hbm %s628_s0, 256 }
   0x3   :  { %s15_s10 = sshll.u32 %s446_s9, 4  ;;  %p375_p0 = scmp.ne.s32.totalorder %s628_s0, %s374_s13  ;;  %s16_s10 = int_to_ptr.vmem [resolvable:$true] %s15_s10 }
   0x4   :  { %p378_p1 = scmp.lt.u32.totalorder %s374_s13, %s628_s0 }
   0x6   :  { %p380_p2 = pnand %p378_p1, %p375_p0 }
   0x8   :  { %383 = shalt.err (!%p380_p2)
}
   0x9   :  { %s384_s18 = scalar_lea.vmem %s16_s10, 256  ;;  %p389_p4 = scmp.lt.s32.totalorder %s16_s10, %s16_s10 }
   0xa   :  { %p385_p3 = scmp.ne.s32.totalorder %s16_s10, %s384_s18  ;;  %p390_p5 = scmp.lt.s32.totalorder %s384_s18, %s384_s18 }
   0xc   :  { %p391_p6 = por %p390_p5, %p389_p4 }
   0xe   :  { %p392_p7 = pnand %p391_p6, %p385_p3 }
  0x10   :  { %395 = shalt.err (!%p392_p7)
}
  0x11   :  { %s447_s19 = smov 128   ;;  %s448_s20 = smov 8  }
  0x12   :  { %21 = dma.hbm_to_vmem [thread:$0]  %s628_s0, 256, %s16_s10, [#allocation3], %s447_s19, %s447_s19, %s448_s20  }
  0x13   :  { %s449_s23 = smov [#allocation5]   ;;  %s396_s27 = scalar_lea.hbm %s629_s1, 64 }
  0x14   :  { %s27_s24 = sshll.u32 %s449_s23, 4  ;;  %p397_p8 = scmp.ne.s32.totalorder %s629_s1, %s396_s27  ;;  %s28_s24 = int_to_ptr.vmem [resolvable:$true] %s27_s24 }
  0x15   :  { %p400_p9 = scmp.lt.u32.totalorder %s396_s27, %s629_s1 }
  0x17   :  { %p402_p10 = pnand %p400_p9, %p397_p8 }
  0x19   :  { %405 = shalt.err (!%p402_p10)
}
  0x1a   :  { %s406_s4 = scalar_lea.vmem %s28_s24, 64  ;;  %p411_p12 = scmp.lt.s32.totalorder %s28_s24, %s28_s24 }
  0x1b   :  { %p407_p11 = scmp.ne.s32.totalorder %s28_s24, %s406_s4  ;;  %p412_p13 = scmp.lt.s32.totalorder %s406_s4, %s406_s4 }
  0x1d   :  { %p413_p0 = por %p412_p13, %p411_p12 }
  0x1f   :  { %p414_p1 = pnand %p413_p0, %p407_p11 }
  0x21   :  { %417 = shalt.err (!%p414_p1)
}
  0x22   :  { %s450_s0 = smov 32   ;;  %s451_s5 = smov 2  }
  0x23   :  { %33 = dma.hbm_to_vmem [thread:$0]  %s629_s1, 64, %s28_s24, [#allocation6], %s450_s0, %s450_s0, %s451_s5  }
  0x24   :  { %440 = dma.done.wait [#allocation3], 256  }
  0x25   :  { %441 = vsyncadd [#allocation3], 4294967040 }
  0x26   :  { %442 = dma.done.wait [#allocation6], 64  }
  0x27   :  { %443 = vsyncadd [#allocation6], 4294967232  ;;  %v79_v0 = vlaneseq  ;;  %vm50_vm0 = vcmask 1043456   ;;  %v40_v1 = vld [vmem:[#allocation2] sm:$0xff]  ;;  %v500_v3 = vld [vmem:[#allocation2 + $0x8] sm:$0xff]  ;;  %s454_s1 = smov [#allocation7]  }
  0x28   :  { %v46_v4 = vcombine.high %v40_v1, %v40_v1  ;;  %v51_v5 = vsel %vm50_vm0, %v40_v1, -inf  ;;  %v506_v8 = vcombine.high %v500_v3, %v500_v3  ;;  %v65_v12 = vsel %vm50_vm0, %v500_v3, -inf  ;;  %v513_v13 = vld [vmem:[#allocation5] sm:$0x3]  ;;  %v547_v45 = vld [vmem:[#allocation5 + $0x2] sm:$0x3] }
  0x29   :  { %v498_v2 = vshrl.u32 %v79_v0, 7  ;;  %v52_v6 = vrot.slane %v51_v5, 4  ;;  %v66_v17 = vrot.slane %v65_v12, 4  ;;  %vm245_vm5 = vcmp.eq.s32.totalorder %v513_v13, 0  ;;  %s330_s8 = sshll.u32 %s454_s1, 4  ;;  %s331_s8 = int_to_ptr.vmem [resolvable:$true] %s330_s8 }
  0x2a   :  { %v58_v7 = vsel %vm50_vm0, %v46_v4, -inf  ;;  %v72_v18 = vsel %vm50_vm0, %v506_v8, -inf  ;;  %vm246_vm6 = vcmp.eq.s32.totalorder %v547_v45, 0  ;;  %vm321_vm7 = vcmp.lt.s32.totalorder %v79_v0, 256  ;;  %s418_s9 = scalar_lea.vmem %s331_s8, 64  ;;  %p423_p3 = scmp.lt.s32.totalorder %s331_s8, %s331_s8 }
  0x2b   :  { %v53_v9 = vmax.f32 %v51_v5, %v52_v6  ;;  %v59_v10 = vrot.slane %v58_v7, 4  ;;  %v509_v11 = vsub.s32 0, %v498_v2  ;;  %v516_v16 = vsub.s32 1, %v498_v2  ;;  %p419_p2 = scmp.ne.s32.totalorder %s331_s8, %s418_s9  ;;  %p424_p4 = scmp.lt.s32.totalorder %s418_s9, %s418_s9 }
  0x2c   :  { %v67_v22 = vmax.f32 %v65_v12, %v66_v17  ;;  %v73_v23 = vrot.slane %v72_v18, 4 }
  0x2d   :  { %v54_v14 = vrot.slane %v53_v9, 2  ;;  %v60_v15 = vmax.f32 %v58_v7, %v59_v10  ;;  %v84_v21 = vrot.slane %v513_v13, %v509_v11  ;;  %v88_v26 = vrot.slane %v513_v13, %v516_v16  ;;  %p425_p5 = por %p424_p4, %p423_p3 }
  0x2e   :  { %v68_v27 = vrot.slane %v67_v22, 2  ;;  %v74_v28 = vmax.f32 %v72_v18, %v73_v23  ;;  %v92_v51 = vrot.slane %v547_v45, %v509_v11  ;;  %v96_v54 = vrot.slane %v547_v45, %v516_v16 }
  0x2f   :  { %v55_v19 = vmax.f32 %v53_v9, %v54_v14  ;;  %v61_v20 = vrot.slane %v60_v15, 2  ;;  %vm527_vm1 = vcmp.eq.s32.totalorder %v498_v2, %v84_v21  ;;  %vm534_vm2 = vcmp.eq.s32.totalorder %v498_v2, %v88_v26  ;;  %p426_p6 = pnand %p425_p5, %p419_p2 }
  0x30   :  { %v69_v32 = vmax.f32 %v67_v22, %v68_v27  ;;  %v75_v33 = vrot.slane %v74_v28, 2  ;;  %v101_v36 = vsel %vm527_vm1, %v40_v1, 0.0  ;;  %v102_v42 = vsel %vm534_vm2, %v46_v4, 0.0 }
  0x31   :  { %v56_v24 = vrot.slane %v55_v19, 1  ;;  %v62_v25 = vmax.f32 %v60_v15, %v61_v20  ;;  %v105_v43 = vsel %vm50_vm0, %v101_v36, 0.0  ;;  %v112_v49 = vsel %vm50_vm0, %v102_v42, 0.0 }
  0x32   :  { %v70_v37 = vrot.slane %v69_v32, 1  ;;  %v76_v38 = vmax.f32 %v74_v28, %v75_v33  ;;  %v106_v48 = vrot.slane %v105_v43, 4  ;;  %v113_v53 = vrot.slane %v112_v49, 4 }
  0x33   :  { %v524_v29 = vmax.f32 %v55_v19, %v56_v24  ;;  %v63_v30 = vrot.slane %v62_v25, 1  ;;  %vm560_vm3 = vcmp.eq.s32.totalorder %v498_v2, %v92_v51  ;;  %vm565_vm4 = vcmp.eq.s32.totalorder %v498_v2, %v96_v54 }
  0x34   :  { %v542_v40 = vmax.f32 %v69_v32, %v70_v37  ;;  %v77_v41 = vrot.slane %v76_v38, 1  ;;  %v107_v55 = vadd.f32 %v106_v48, %v105_v43  ;;  %v114_v58 = vadd.f32 %v113_v53, %v112_v49 }
  0x35   :  { %v531_v34 = vmax.f32 %v62_v25, %v63_v30  ;;  %v103_v61 = vsel %vm560_vm3, %v500_v3, 0.0  ;;  %v104_v62 = vsel %vm565_vm4, %v506_v8, 0.0 }
  0x36   :  { %v549_v46 = vmax.f32 %v76_v38, %v77_v41  ;;  %v108_v60 = vrot.slane %v107_v55, 2  ;;  %v119_v4 = vsel %vm50_vm0, %v103_v61, 0.0 }
  0x37   :  { %v137_v39 = vcombine.low %v524_v29, %v531_v34  ;;  %v120_v17 = vrot.slane %v119_v4, 4 }
  0x38   :  { %v138_v50 = vcombine.low %v542_v40, %v549_v46  ;;  %v576_v5 = vadd.f32 %v108_v60, %v107_v55 }
  0x39   :  { %v141_v44 = vsub.f32 %v40_v1, %v137_v39  ;;  %v115_v1 = vrot.slane %v114_v58, 2  ;;  %v121_v33 = vadd.f32 %v120_v17, %v119_v4 }
  0x3a   :  { %v142_v52 = vsub.f32 %v500_v3, %v138_v50  ;;  %v126_v3 = vsel %vm50_vm0, %v104_v62, 0.0  ;;  %v110_v23 = vrot.slane %v576_v5, 1 }
  0x3b   :  { %v143_v47 = vmul.f32 1.442695, %v141_v44  ;;  %v586_v18 = vadd.f32 %v115_v1, %v114_v58  ;;  %v127_v26 = vrot.slane %v126_v3, 4  ;;  %v122_v53 = vrot.slane %v121_v33, 2 }
  0x3c   :  { %v145_v56 = vmul.f32 1.442695, %v142_v52 }
  0x3d   :  { %354 = vpow2.f32 %v143_v47  ;;  %v128_v43 = vadd.f32 %v127_v26, %v126_v3  ;;  %v123_v3 = vadd.f32 %v122_v53, %v121_v33 }
  0x3e   :  { %356 = vpow2.f32 %v145_v56 }
  0x3f   :  { %v129_v61 = vrot.slane %v128_v43, 2  ;;  %v124_v26 = vrot.slane %v123_v3, 1 }
  0x47   :  { %v355_v63 = vpop.eup %354 }
  0x48   :  { %v149_v6 = vcombine.high %v355_v63, %v355_v63  ;;  %v153_v7 = vsel %vm50_vm0, %v355_v63, 0.0  ;;  %v197_v9 = vsel %vm527_vm1, %v355_v63, 0.0  ;;  %v357_v22 = vpop.eup %356 }
  0x49   :  { %v154_v10 = vrot.slane %v153_v7, 4  ;;  %v201_v12 = vsel %vm50_vm0, %v197_v9, 0.0  ;;  %v150_v30 = vcombine.high %v357_v22, %v357_v22  ;;  %v167_v31 = vsel %vm50_vm0, %v357_v22, 0.0 }
  0x4a   :  { %v160_v14 = vsel %vm50_vm0, %v149_v6, 0.0  ;;  %v198_v8 = vsel %vm534_vm2, %v149_v6, 0.0  ;;  %v202_v15 = vrot.slane %v201_v12, 4  ;;  %v168_v35 = vrot.slane %v167_v31, 4 }
  0x4b   :  { %v155_v19 = vadd.f32 %v154_v10, %v153_v7  ;;  %v161_v20 = vrot.slane %v160_v14, 4  ;;  %v208_v21 = vsel %vm50_vm0, %v198_v8, 0.0  ;;  %v199_v36 = vsel %vm560_vm3, %v357_v22, 0.0 }
  0x4c   :  { %v203_v24 = vadd.f32 %v202_v15, %v201_v12  ;;  %v209_v25 = vrot.slane %v208_v21, 4  ;;  %v174_v39 = vsel %vm50_vm0, %v150_v30, 0.0  ;;  %v200_v41 = vsel %vm565_vm4, %v150_v30, 0.0 }
  0x4d   :  { %v156_v27 = vrot.slane %v155_v19, 2  ;;  %v162_v28 = vadd.f32 %v161_v20, %v160_v14  ;;  %v169_v44 = vadd.f32 %v168_v35, %v167_v31  ;;  %v175_v47 = vrot.slane %v174_v39, 4 }
  0x4e   :  { %v210_v32 = vadd.f32 %v209_v25, %v208_v21  ;;  %v204_v42 = vrot.slane %v203_v24, 2  ;;  %v215_v50 = vsel %vm50_vm0, %v199_v36, 0.0  ;;  %v222_v51 = vsel %vm50_vm0, %v200_v41, 0.0 }
  0x4f   :  { %v157_v37 = vadd.f32 %v156_v27, %v155_v19  ;;  %v163_v38 = vrot.slane %v162_v28, 2  ;;  %v170_v54 = vrot.slane %v169_v44, 2  ;;  %v176_v55 = vadd.f32 %v175_v47, %v174_v39 }
  0x50   :  { %v211_v52 = vrot.slane %v210_v32, 2  ;;  %v216_v58 = vrot.slane %v215_v50, 4  ;;  %v223_v60 = vrot.slane %v222_v51, 4  ;;  %v205_v59 = vadd.f32 %v204_v42, %v203_v24 }
  0x51   :  { %v158_v48 = vrot.slane %v157_v37, 1  ;;  %v164_v49 = vadd.f32 %v163_v38, %v162_v28  ;;  %v171_v62 = vadd.f32 %v170_v54, %v169_v44  ;;  %v177_v63 = vrot.slane %v176_v55, 2 }
  0x52   :  { %v217_v4 = vadd.f32 %v216_v58, %v215_v50  ;;  %v224_v6 = vadd.f32 %v223_v60, %v222_v51  ;;  %v117_v7 = vrot.slane %v586_v18, 1  ;;  %v212_v12 = vadd.f32 %v211_v52, %v210_v32 }
  0x53   :  { %v159_v56 = vadd.f32 %v158_v48, %v157_v37  ;;  %v165_v57 = vrot.slane %v164_v49, 1  ;;  %v172_v9 = vrot.slane %v171_v62, 1  ;;  %v178_v10 = vadd.f32 %v177_v63, %v176_v55 }
  0x54   :  { %v218_v14 = vrot.slane %v217_v4, 2  ;;  %v225_v17 = vrot.slane %v224_v6, 2  ;;  %v206_v19 = vrot.slane %v205_v59, 1  ;;  %v130_v20 = vadd.f32 %v129_v61, %v128_v43 }
  0x55   :  { %v166_v1 = vadd.f32 %v165_v57, %v164_v49  ;;  %358 = vlog2.f32 %v159_v56  ;;  %v173_v8 = vadd.f32 %v172_v9, %v171_v62  ;;  %v179_v15 = vrot.slane %v178_v10, 1 }
  0x56   :  { %360 = vrcp.f32 %v159_v56  ;;  %v111_v21 = vadd.f32 %v110_v23, %v576_v5  ;;  %v219_v24 = vadd.f32 %v218_v14, %v217_v4  ;;  %v213_v25 = vrot.slane %v212_v12, 1 }
  0x57   :  { %362 = vlog2.f32 %v166_v1  ;;  %v180_v22 = vadd.f32 %v179_v15, %v178_v10  ;;  %v118_v27 = vadd.f32 %v117_v7, %v586_v18  ;;  %v226_v28 = vadd.f32 %v225_v17, %v224_v6 }
  0x58   :  { %364 = vrcp.f32 %v166_v1  ;;  %v207_v30 = vadd.f32 %v206_v19, %v205_v59  ;;  %v452_v31 = vmov 0.75   ;;  %v131_v33 = vrot.slane %v130_v20, 1 }
  0x59   :  { %366 = vlog2.f32 %v173_v8  ;;  %v247_v32 = vsel %vm245_vm5, 0.25, %v452_v31  ;;  %v181_v13 = vsub.f32 %v111_v21, %v524_v29  ;;  %v220_v35 = vrot.slane %v219_v24, 1 }
  0x5a   :  { %368 = vrcp.f32 %v173_v8  ;;  %v214_v23 = vadd.f32 %v213_v25, %v212_v12  ;;  %v125_v36 = vadd.f32 %v124_v26, %v123_v3  ;;  %v182_v38 = vsub.f32 %v118_v27, %v531_v34 }
  0x5b   :  { %370 = vlog2.f32 %v180_v22  ;;  %v254_v18 = vrot.slane %v247_v32, %v509_v11  ;;  %v227_v41 = vrot.slane %v226_v28, 1  ;;  %v453_v44 = vmov 1966171168  }
  0x5c   :  { %372 = vrcp.f32 %v180_v22  ;;  %v289_v47 = vunpack.c.l.s4 %v453_v44  ;;  %v132_v48 = vadd.f32 %v131_v33, %v130_v20  ;;  %v248_v49 = vsel %vm246_vm6, 0.25, %v452_v31 }
  0x5d   :  { %v258_v45 = vrot.slane %v247_v32, %v516_v16  ;;  %v221_v52 = vadd.f32 %v220_v35, %v219_v24  ;;  %v183_v34 = vsub.f32 %v125_v36, %v542_v40  ;;  %v228_v58 = vadd.f32 %v227_v41, %v226_v28 }
  0x5e   :  { %v262_v60 = vrot.slane %v248_v49, %v509_v11  ;;  %v184_v63 = vsub.f32 %v132_v48, %v549_v46  ;;  %v290_v7 = vunpack.c.0.s8 %v289_v47  ;;  %v266_v10 = vrot.slane %v248_v49, %v516_v16 }
  0x5f   :  { %v359_v5 = vpop.eup %358 }
  0x60   :  { %v361_v37 = vpop.eup %360  ;;  %v186_v39 = vmul.f32 0.6931472, %v359_v5  ;;  %v293_v25 = vsub.s32 %v290_v7, %v498_v2 }
  0x61   :  { %v363_v42 = vpop.eup %362  ;;  %v230_v43 = vmul.f32 %v361_v37, %v207_v30 }
  0x62   :  { %v365_v29 = vpop.eup %364  ;;  %v188_v50 = vmul.f32 0.6931472, %v363_v42  ;;  %v193_v51 = vsub.f32 %v181_v13, %v186_v39 }
  0x63   :  { %v232_v53 = vmul.f32 %v365_v29, %v214_v23  ;;  %v237_v54 = vsub.f32 1.0, %v230_v43  ;;  %v367_v55 = vpop.eup %366 }
  0x64   :  { %v194_v56 = vsub.f32 %v182_v38, %v188_v50  ;;  %v271_v57 = vmul.f32 %v254_v18, %v193_v51  ;;  %v369_v59 = vpop.eup %368  ;;  %v190_v1 = vmul.f32 0.6931472, %v367_v55 }
  0x65   :  { %v238_v61 = vsub.f32 1.0, %v232_v53  ;;  %v241_v62 = vmul.f32 %v237_v54, %v237_v54  ;;  %v371_v4 = vpop.eup %370  ;;  %v234_v9 = vmul.f32 %v369_v59, %v221_v52 }
  0x66   :  { %v272_v6 = vmul.f32 %v258_v45, %v194_v56  ;;  %v373_v12 = vpop.eup %372  ;;  %v192_v14 = vmul.f32 0.6931472, %v371_v4  ;;  %v195_v8 = vsub.f32 %v183_v34, %v190_v1 }
  0x67   :  { %v242_v40 = vmul.f32 %v238_v61, %v238_v61  ;;  %v275_v3 = vmul.f32 %v271_v57, %v241_v62  ;;  %v236_v15 = vmul.f32 %v373_v12, %v228_v58  ;;  %v239_v17 = vsub.f32 1.0, %v234_v9 }
  0x68   :  { %v196_v20 = vsub.f32 %v184_v63, %v192_v14  ;;  %v273_v21 = vmul.f32 %v262_v60, %v195_v8 }
  0x69   :  { %v276_v11 = vmul.f32 %v272_v6, %v242_v40  ;;  %v279_v19 = vsub.f32 0.0, %v275_v3  ;;  %v240_v22 = vsub.f32 1.0, %v236_v15  ;;  %v243_v46 = vmul.f32 %v239_v17, %v239_v17 }
  0x6a   :  { %v274_v26 = vmul.f32 %v266_v10, %v196_v20 }
  0x6b   :  { %v280_v24 = vsub.f32 0.0, %v276_v11  ;;  %v244_v27 = vmul.f32 %v240_v22, %v240_v22  ;;  %v277_v28 = vmul.f32 %v273_v21, %v243_v46 }
  0x6d   :  { %v287_v16 = vcombine.low %v279_v19, %v280_v24  ;;  %v278_v30 = vmul.f32 %v274_v26, %v244_v27  ;;  %v281_v31 = vsub.f32 0.0, %v277_v28 }
  0x6f   :  { %v294_v32 = vrot.slane %v287_v16, %v293_v25  ;;  %v282_v33 = vsub.f32 0.0, %v278_v30 }
  0x71   :  { %v301_v13 = vrot.slane %v294_v32, %v293_v25  ;;  %v302_v35 = vcombine.low %v281_v31, %v282_v33 }
  0x73   :  { %323 = vst.msk [vmem:[#allocation7] sm:$0x3] %vm321_vm7, %v301_v13  ;;  %v309_v5 = vrot.slane %v302_v35, %v293_v25 }
  0x75   :  { %v316_v23 = vrot.slane %v309_v5, %v293_v25 }
  0x77   :  { %324 = vst.msk [vmem:[#allocation7 + $0x2] sm:$0x3] %vm321_vm7, %v316_v23 }
  0x78   :  { %429 = shalt.err (!%p426_p6)
}
  0x79   :  { %s430_s12 = scalar_lea.hbm %s630_s2, 64 }
  0x7a   :  { %p431_p7 = scmp.ne.s32.totalorder %s630_s2, %s430_s12  ;;  %p434_p8 = scmp.lt.u32.totalorder %s430_s12, %s630_s2 }
  0x7c   :  { %p436_p9 = pnand %p434_p8, %p431_p7 }
  0x7e   :  { %439 = shalt.err (!%p436_p9)
}
  0x7f   :  { %336 = dma.vmem_to_hbm [thread:$0]  %s331_s8, 64, %s630_s2, [#allocation4], %s450_s0, %s450_s0, %s451_s5  }
  0x80   :  { %444 = dma.done.wait [#allocation4], 64  }
  0x81   :  { %445 = vsyncadd [#allocation4], 4294967232 }
  0x82   :  { %340 = vsyncpa [#allocation3], 1 }
  0x83   :  { %341 = vsyncpa [#allocation6], 1 }
  0x84   :  { %342 = vsyncpa [#allocation4], 1 }

</bundles_post_ra>
